<compile_context>
chip_gen: v6e
topology: v6e:2x2x1
jax: 0.10.0
libtpu: 0.0.40
codegen_flags: <defaults>
</compile_context>

<pallas_src>
import functools

import jax
import jax.numpy as jnp
from jax.experimental import pallas as pl
from jax.experimental.pallas import tpu as pltpu


def _pa_kernel(x_ref, w1_ref, b1_ref, a_ref, w2t_ref, b2_ref, o_ref):
  """Fused PALayer for one (batch, spatial-tile) block.

  x_ref   : (1, C, P)       input block (channels on sublanes, pixels on lanes)
  w1_ref  : (Cmid_pad, C)   conv1 weight (zero-padded rows)
  b1_ref  : (Cmid_pad, 1)   conv1 bias
  a_ref   : (1, 1)          PReLU parameter (single shared value)
  w2t_ref : (Cmid_pad, 1)   conv2 weight, transposed (zero-padded rows)
  b2_ref  : (1, 1)          conv2 bias
  o_ref   : (1, C, P)       output block
  """
  xf = x_ref[0].astype(jnp.float32)                      # (C, P)

  # conv1 (1x1) over channels: (Cmid_pad, C) @ (C, P) -> (Cmid_pad, P)  [MXU]
  h = jnp.dot(w1_ref[...], xf, preferred_element_type=jnp.float32)
  h = h + b1_ref[...]                                    # (Cmid_pad, 1) bcast

  # PReLU with a single shared parameter: max(0,h) + a*min(0,h)
  a = a_ref[...]                                         # (1, 1)
  h = jnp.maximum(h, 0.0) + a * jnp.minimum(h, 0.0)

  # conv2 (1x1, Cmid -> 1): broadcast-mul + sublane reduction (XLU).
  # Padded rows of w2t are zero, so they do not contribute.
  y = jnp.sum(w2t_ref[...] * h, axis=0, keepdims=True) + b2_ref[...]   # (1, P)

  # sigmoid (EUP exp + VPU recip)
  y = 1.0 / (1.0 + jnp.exp(-y))

  # pixel attention: out = x * y, broadcast over the channel (sublane) axis
  o_ref[0] = (xf * y).astype(o_ref.dtype)


def _pick_spatial_tile(hw, max_tile=4096):
  """Largest lane-dense divisor of hw (<= max_tile); whole extent if small."""
  if hw <= max_tile:
    return hw
  for t in range(max_tile, 127, -1):
    if hw % t == 0 and t % 128 == 0:
      return t
  return hw  # fallback: single block over the whole spatial extent


def pa_layer(x_nchw, w1, b1, w2, b2, prelu_a):
  """Pallas forward matching PALayer.forward (NCHW in / NCHW out).

  w1: (C//8, C, 1, 1)  b1: (C//8,)
  w2: (1, C//8, 1, 1)  b2: (1,)
  prelu_a: (1,)  (nn.PReLU() default: one shared parameter)
  """
  N, C, H, W = x_nchw.shape
  Cm = w1.shape[0]                         # channel // 8
  HW = H * W
  tile_p = _pick_spatial_tile(HW)
  grid = (N, HW // tile_p)

  # Flatten spatial (free reshape, NCHW is contiguous in H*W).
  x2 = x_nchw.reshape(N, C, HW)

  # Sublane-align the hidden dim; padded rows have zero weight & bias so the
  # padded lanes of h are exactly 0 and drop out of the conv2 reduction.
  Cm_pad = max(8, ((Cm + 7) // 8) * 8)
  w1p = jnp.zeros((Cm_pad, C), jnp.float32).at[:Cm].set(w1.reshape(Cm, C))
  b1p = jnp.zeros((Cm_pad, 1), jnp.float32).at[:Cm, 0].set(b1)
  w2t = jnp.zeros((Cm_pad, 1), jnp.float32).at[:Cm, 0].set(w2.reshape(Cm))
  b2p = b2.reshape(1, 1).astype(jnp.float32)
  a2d = prelu_a.reshape(1, 1).astype(jnp.float32)

  out = pl.pallas_call(
      _pa_kernel,
      out_shape=jax.ShapeDtypeStruct((N, C, HW), x_nchw.dtype),
      grid_spec=pltpu.PrefetchScalarGridSpec(
          num_scalar_prefetch=0,
          grid=grid,
          in_specs=[
              pl.BlockSpec((1, C, tile_p), lambda n, p: (n, 0, p)),
              pl.BlockSpec((Cm_pad, C), lambda n, p: (0, 0)),
              pl.BlockSpec((Cm_pad, 1), lambda n, p: (0, 0)),
              pl.BlockSpec((1, 1), lambda n, p: (0, 0)),
              pl.BlockSpec((Cm_pad, 1), lambda n, p: (0, 0)),
              pl.BlockSpec((1, 1), lambda n, p: (0, 0)),
          ],
          out_specs=pl.BlockSpec((1, C, tile_p), lambda n, p: (n, 0, p))),
      compiler_params=pltpu.CompilerParams(
          dimension_semantics=("parallel", "parallel")),
  )(x2, w1p, b1p, a2d, w2t, b2p)

  return out.reshape(N, C, H, W)


def _reference_forward(x, w1, b1, w2, b2, prelu_a):
  """Pure-JAX reference for correctness checking."""
  N, C, H, W = x.shape
  Cm = w1.shape[0]
  xf = x.reshape(N, C, H * W).astype(jnp.float32)
  h = jnp.einsum("oc,ncp->nop", w1.reshape(Cm, C), xf) + b1.reshape(1, Cm, 1)
  a = prelu_a.reshape(())
  h = jnp.maximum(h, 0.0) + a * jnp.minimum(h, 0.0)
  y = jnp.einsum("oc,ncp->nop", w2.reshape(1, Cm), h) + b2.reshape(1, 1, 1)
  y = jax.nn.sigmoid(y)
  return (xf * y).reshape(N, C, H, W).astype(x.dtype)


if __name__ == "__main__":
  # channel must be >= 8 so that channel // 8 >= 1 (as the module requires).
  N, C, H, W = 2, 32, 16, 16
  Cm = C // 8

  key = jax.random.PRNGKey(0)
  kx, k1, kb1, k2, kb2 = jax.random.split(key, 5)
  x = jax.random.normal(kx, (N, C, H, W), jnp.float32)        # NCHW, like PyTorch
  w1 = jax.random.normal(k1, (Cm, C, 1, 1), jnp.float32) * 0.1
  b1 = jax.random.normal(kb1, (Cm,), jnp.float32) * 0.1
  w2 = jax.random.normal(k2, (1, Cm, 1, 1), jnp.float32) * 0.1
  b2 = jax.random.normal(kb2, (1,), jnp.float32) * 0.1
  prelu_a = jnp.full((1,), 0.25, jnp.float32)                 # nn.PReLU() default

  out = pa_layer(x, w1, b1, w2, b2, prelu_a)
  out = jax.block_until_ready(out)

  ref = _reference_forward(x, w1, b1, w2, b2, prelu_a)
  assert out.shape == (N, C, H, W)
  assert jnp.allclose(out, ref, atol=1e-4, rtol=1e-4), "mismatch vs reference"

  print("KERNEL_OK")
</pallas_src>

<mosaic_0001>
module attributes {stable_mosaic.version = 11 : i64} {
  func.func @_pa_kernel(%arg0: i32, %arg1: i32, %arg2: memref<1x32x256xf32, #tpu.memory_space<vmem>>, %arg3: memref<8x32xf32, #tpu.memory_space<vmem>>, %arg4: memref<8x1xf32, #tpu.memory_space<vmem>>, %arg5: memref<1x1xf32, #tpu.memory_space<vmem>>, %arg6: memref<8x1xf32, #tpu.memory_space<vmem>>, %arg7: memref<1x1xf32, #tpu.memory_space<vmem>>, %arg8: memref<1x32x256xf32, #tpu.memory_space<vmem>>) attributes {dimension_semantics = [#tpu.dimension_semantics<parallel>, #tpu.dimension_semantics<parallel>], iteration_bounds = array<i64: 2, 1>, scalar_prefetch = 0 : i64, scratch_operands = 0 : i64, tpu.core_type = #tpu.core_type<tc>, window_params = [{transform_indices = @transform_0, window_bounds = array<i64: 1, 32, 256>}, {pipeline_mode = #tpu.pipeline_mode<synchronous>, transform_indices = @transform_1, window_bounds = array<i64: 8, 32>}, {pipeline_mode = #tpu.pipeline_mode<synchronous>, transform_indices = @transform_2, window_bounds = array<i64: 8, 1>}, {pipeline_mode = #tpu.pipeline_mode<synchronous>, transform_indices = @transform_3, window_bounds = array<i64: 1, 1>}, {pipeline_mode = #tpu.pipeline_mode<synchronous>, transform_indices = @transform_4, window_bounds = array<i64: 8, 1>}, {pipeline_mode = #tpu.pipeline_mode<synchronous>, transform_indices = @transform_5, window_bounds = array<i64: 1, 1>}, {transform_indices = @transform_6, window_bounds = array<i64: 1, 32, 256>}]} {
    %c0 = arith.constant 0 : index
    %c0_0 = arith.constant 0 : index
    %c0_1 = arith.constant 0 : index
    %0 = vector.load %arg2[%c0, %c0_0, %c0_1] : memref<1x32x256xf32, #tpu.memory_space<vmem>>, vector<1x32x256xf32>
    %1 = vector.shape_cast %0 : vector<1x32x256xf32> to vector<32x256xf32>
    %c0_2 = arith.constant 0 : index
    %c0_3 = arith.constant 0 : index
    %2 = vector.load %arg3[%c0_2, %c0_3] : memref<8x32xf32, #tpu.memory_space<vmem>>, vector<8x32xf32>
    %cst = arith.constant dense<0.000000e+00> : vector<8x256xf32>
    %3 = tpu.matmul %2, %1, %cst {dimension_numbers = #tpu.dot_dimension_numbers<[1], [0], [0], [1], [0, 0, 1, 1], [], []>} : vector<8x32xf32>, vector<32x256xf32>, vector<8x256xf32> -> vector<8x256xf32>
    %c0_4 = arith.constant 0 : index
    %c0_5 = arith.constant 0 : index
    %4 = vector.load %arg4[%c0_4, %c0_5] : memref<8x1xf32, #tpu.memory_space<vmem>>, vector<8x1xf32>
    %5 = vector.broadcast %4 : vector<8x1xf32> to vector<8x256xf32>
    %6 = arith.addf %3, %5 : vector<8x256xf32>
    %c0_6 = arith.constant 0 : index
    %c0_7 = arith.constant 0 : index
    %7 = vector.load %arg5[%c0_6, %c0_7] : memref<1x1xf32, #tpu.memory_space<vmem>>, vector<1x1xf32>
    %cst_8 = arith.constant 0.000000e+00 : f32
    %8 = vector.broadcast %cst_8 : f32 to vector<8x256xf32>
    %9 = arith.maximumf %6, %8 : vector<8x256xf32>
    %cst_9 = arith.constant 0.000000e+00 : f32
    %10 = vector.broadcast %cst_9 : f32 to vector<8x256xf32>
    %11 = arith.minimumf %6, %10 : vector<8x256xf32>
    %12 = vector.broadcast %7 : vector<1x1xf32> to vector<8x256xf32>
    %13 = arith.mulf %12, %11 : vector<8x256xf32>
    %14 = arith.addf %9, %13 : vector<8x256xf32>
    %c0_10 = arith.constant 0 : index
    %c0_11 = arith.constant 0 : index
    %15 = vector.load %arg6[%c0_10, %c0_11] : memref<8x1xf32, #tpu.memory_space<vmem>>, vector<8x1xf32>
    %16 = vector.broadcast %15 : vector<8x1xf32> to vector<8x256xf32>
    %17 = arith.mulf %16, %14 : vector<8x256xf32>
    %cst_12 = arith.constant dense<0.000000e+00> : vector<256xf32>
    %18 = vector.multi_reduction <add>, %17, %cst_12 [0] : vector<8x256xf32> to vector<256xf32>
    %19 = vector.shape_cast %18 : vector<256xf32> to vector<1x256xf32>
    %c0_13 = arith.constant 0 : index
    %c0_14 = arith.constant 0 : index
    %20 = vector.load %arg7[%c0_13, %c0_14] : memref<1x1xf32, #tpu.memory_space<vmem>>, vector<1x1xf32>
    %21 = vector.broadcast %20 : vector<1x1xf32> to vector<1x256xf32>
    %22 = arith.addf %19, %21 : vector<1x256xf32>
    %cst_15 = arith.constant 0.000000e+00 : f32
    %23 = vector.broadcast %cst_15 : f32 to vector<1x256xf32>
    %24 = arith.subf %23, %22 : vector<1x256xf32>
    %25 = math.exp %24 : vector<1x256xf32>
    %cst_16 = arith.constant 1.000000e+00 : f32
    %26 = vector.broadcast %cst_16 : f32 to vector<1x256xf32>
    %27 = arith.addf %26, %25 : vector<1x256xf32>
    %cst_17 = arith.constant 1.000000e+00 : f32
    %28 = vector.broadcast %cst_17 : f32 to vector<1x256xf32>
    %29 = arith.divf %28, %27 : vector<1x256xf32>
    %30 = vector.broadcast %29 : vector<1x256xf32> to vector<32x256xf32>
    %31 = arith.mulf %1, %30 : vector<32x256xf32>
    %c0_18 = arith.constant 0 : index
    %c0_19 = arith.constant 0 : index
    %c0_20 = arith.constant 0 : index
    %32 = vector.load %arg8[%c0_18, %c0_19, %c0_20] : memref<1x32x256xf32, #tpu.memory_space<vmem>>, vector<1x32x256xf32>
    %33 = vector.shape_cast %32 : vector<1x32x256xf32> to vector<32x256xf32>
    %34 = vector.shape_cast %31 : vector<32x256xf32> to vector<1x32x256xf32>
    tpu.vector_store %arg8[%c0_18, %c0_19, %c0_20], %34 {strides = array<i32>} : memref<1x32x256xf32, #tpu.memory_space<vmem>>, vector<1x32x256xf32>,
    return
  }
  func.func @transform_0(%arg0: i32, %arg1: i32) -> (i32, i32, i32) {
    %c0_i32 = arith.constant 0 : i32
    %c0_i32_0 = arith.constant 0 : i32
    return %arg0, %c0_i32, %arg1 : i32, i32, i32
  }
  func.func @transform_1(%arg0: i32, %arg1: i32) -> (i32, i32) {
    %c0_i32 = arith.constant 0 : i32
    %c0_i32_0 = arith.constant 0 : i32
    %c0_i32_1 = arith.constant 0 : i32
    return %c0_i32, %c0_i32_0 : i32, i32
  }
  func.func @transform_2(%arg0: i32, %arg1: i32) -> (i32, i32) {
    %c0_i32 = arith.constant 0 : i32
    %c0_i32_0 = arith.constant 0 : i32
    %c0_i32_1 = arith.constant 0 : i32
    return %c0_i32, %c0_i32_0 : i32, i32
  }
  func.func @transform_3(%arg0: i32, %arg1: i32) -> (i32, i32) {
    %c0_i32 = arith.constant 0 : i32
    %c0_i32_0 = arith.constant 0 : i32
    %c0_i32_1 = arith.constant 0 : i32
    return %c0_i32, %c0_i32_0 : i32, i32
  }
  func.func @transform_4(%arg0: i32, %arg1: i32) -> (i32, i32) {
    %c0_i32 = arith.constant 0 : i32
    %c0_i32_0 = arith.constant 0 : i32
    %c0_i32_1 = arith.constant 0 : i32
    return %c0_i32, %c0_i32_0 : i32, i32
  }
  func.func @transform_5(%arg0: i32, %arg1: i32) -> (i32, i32) {
    %c0_i32 = arith.constant 0 : i32
    %c0_i32_0 = arith.constant 0 : i32
    %c0_i32_1 = arith.constant 0 : i32
    return %c0_i32, %c0_i32_0 : i32, i32
  }
  func.func @transform_6(%arg0: i32, %arg1: i32) -> (i32, i32, i32) {
    %c0_i32 = arith.constant 0 : i32
    %c0_i32_0 = arith.constant 0 : i32
    return %arg0, %c0_i32, %arg1 : i32, i32, i32
  }
}

</mosaic_0001>

<bundles_post_ra>
// kernel: tpu_custom_call.1
= control target key start
LH: loop header
LB: loop body
LE: loop exit
PB: predicated region body
PF: predicated region fallthrough
CT: control target
= control target key end

     0   :  { %s1012_s0 = inlined_call_operand.hbm [shape: f32[2,32,256], index: 0, kind: input, shape index: {}]   ;;  %s1013_s1 = inlined_call_operand.vmem [shape: f32[8,32], index: 1, kind: input, shape index: {}]   ;;  %s1014_s2 = inlined_call_operand.vmem [shape: f32[8,1], index: 2, kind: input, shape index: {}]   ;;  %s1015_s3 = inlined_call_operand.<no memory space> [shape: f32[1,1], index: 3, kind: input, shape index: {}]   ;;  %s1016_s4 = inlined_call_operand.vmem [shape: f32[8,1], index: 4, kind: input, shape index: {}]   ;;  %s1017_s6 = inlined_call_operand.hbm [shape: f32[2,32,256], index: 6, kind: output, shape index: {}]   ;;  %s1018_s5 = inlined_call_operand.<no memory space> [shape: f32[1,1], index: 5, kind: input, shape index: {}]  }
   0x1   :  { %v11_v0 = vstv %s1015_s3  ;;  %v13_v1 = vstv %s1018_s5 }
   0x2   :  { %12 = vst [vmem:[#allocation2] sm:$0x1] %v11_v0  ;;  %14 = vst [vmem:[#allocation3] sm:$0x1] %v13_v1 }
   0x3   :  { %15 = vsyncpa [#allocation5], 0 }
   0x4   :  { %17 = vsyncpa [#allocation5 + $0x1], 0 }
   0x5   :  { %18 = vsyncpa [#allocation6], 0 }
   0x6   :  { %20 = vsyncpa [#allocation6 + $0x1], 0  ;;  %s821_s25 = smov 0   ;;  %s823_s26 = smov 0  }
   0x7   :  { %s825_s27 = smov 0   ;;  %s827_s28 = smov 0  }
   0x8   :  { %s829_s29 = smov 0   ;;  %s831_s3 = smov 0  }
   0x9 LB: > { %s565_s5 = sadd.s32 4294967295, %s770_s3   ;;  %s566_s30 = sadd.s32 4294967294, %s770_s3   ;;  %s770_s3 = sphi %s831_s3, %s26_s3   ;;  %s766_s29 = sphi %s829_s29, %s1029_s29   ;;  %s762_s28 = sphi %s827_s28, %s1028_s28   ;;  %s758_s27 = sphi %s825_s27, %s1027_s27   ;;  %s754_s26 = sphi %s823_s26, %s1026_s26   ;;  %s750_s25 = sphi %s821_s25, %s1025_s25  }
   0xa   : > { %s38_s7 = sadd.s32 1, %s766_s29  ;;  %s47_s8 = sadd.s32 1, %s758_s27 }
   0xb   : > { %p40_p0 = scmp.ge.s32.totalorder %s38_s7, 2  ;;  %p54_p1 = scmp.ne.s32.totalorder %s758_s27, %s754_s26 }
   0xc   : > { %p55_p2 = scmp.eq.s32.totalorder %s770_s3, 0  ;;  %p60_p3 = scmp.ne.s32.totalorder %s754_s26, %s750_s25 }
   0xd   : > { %s1031_s7 = smov (%p40_p0, %s38_s7), 0  ;;  %p61_p5 = scmp.eq.s32.totalorder %s565_s5, 0 }
   0xe   : > { %p862_p4 = por %p55_p2, %p54_p1  ;;  %s42_s10 = ssub.s32 %s766_s29, %s1031_s7 }
   0xf   : > { %p191_p6 = scmp.eq.s32.totalorder %s565_s5, 1  ;;  %p45_p7 = scmp.eq.s32.totalorder %s42_s10, 0 }
  0x10   : > { %p868_p8 = por %p61_p5, %p60_p3  ;;  %p197_p10 = scmp.eq.s32.totalorder %s566_s30, 1 }
  0x11   : > { %p872_p9 = por %p191_p6, %p54_p1  ;;  %p596_p13 = scmp.lt.s32.totalorder %s770_s3, 2 }
  0x12   : > { %s877_s13 = scalar_select %p45_p7, %s758_s27, %s47_s8  }
  0x13   : > { %p879_p11 = por %p197_p10, %p60_p3  ;;  %s232_s15 = sand.u32 1, %s758_s27  }
  0x14   : > { %s569_s16 = sshll.u32 %s232_s15, 6  ;;  %s582_s17 = sshll.u32 %s766_s29, 10 }
  0x15   : > { %s244_s20 = scalar_lea.hbm %s1012_s0, %s582_s17  ;;  %s236_s21 = scalar_lea.vmem [#allocation4], %s569_s16 }
  0x16   : > { %s245_s22 = sshll.u32 %s236_s21, 4  ;;  %p892_p0 = pnand %p596_p13, %p862_p4  ;;  %s246_s22 = int_to_ptr.vmem [resolvable:$true] %s245_s22 }
  0x17   : > { %p572_p1 = scmp.ge.s32.totalorder %s770_s3, 1  ;;  %s233_s24 = scalar_lea.sflag [#allocation5], %s232_s15 }
  0x18   : > { %p664_p2 = pneg %p892_p0  ;;  %s675_s5 = scalar_lea.vmem %s246_s22, 1024 }
  0x19   : > { %p676_p3 = scmp.ne.s32.totalorder %s246_s22, %s675_s5  ;;  %s772_s30 = smov [#allocation4]  }
  0x1a   : > { %s680_s8 = sshll.u32 %s772_s30, 4  ;;  %s681_s8 = int_to_ptr.vmem [resolvable:$false] %s680_s8 }
  0x1b   : > { %p678_p5 = pnand %p676_p3, %p664_p2  ;;  %s682_s10 = scalar_lea.vmem %s681_s8, 2048 }
  0x1c   : > { %p683_p7 = scmp.lt.s32.totalorder %s246_s22, %s681_s8  ;;  %p684_p10 = scmp.lt.s32.totalorder %s682_s10, %s675_s5 }
  0x1d   : > { %p679_p6 = pneg %p678_p5 }
  0x1e   : > { %p685_p12 = por %p684_p10, %p683_p7 }
  0x20   : > { %p686_p4 = pnand %p685_p12, %p679_p6 }
  0x22   : > { %689 = shalt.err (!%p686_p4)
}
  0x23   : > { %s773_s9 = smov 256   ;;  %s774_s15 = smov 16  }
  0x24   : > { %591 = dma.hbm_to_vmem [thread:$0]  (!%p892_p0), %s244_s20, 1024, %s246_s22, %s233_s24, %s773_s9, %s773_s9, %s774_s15  }
  0x25   : > { %p253_p13 = scmp.lt.s32.totalorder %s770_s3, 3 }
  0x27   : > { %p254_p2 = pnand %p572_p1, %p253_p13 }
  0x28   : > { %s905_s16 = sand.u32 (!%p254_p2), 1, %s754_s26  }
  0x29   : > { %257 = sbr.rel (%p254_p2) target bundleno = 328 (0x148), region = 44  ;;  %s573_s17 = sshll.u32 (!%p254_p2), %s905_s16, 6 }
  0x2a   : > { %s260_s18 = scalar_lea.sflag (!%p254_p2), [#allocation5], %s905_s16  ;;  %s263_s19 = scalar_lea.vmem (!%p254_p2), [#allocation4], %s573_s17 }
  0x2e   : > { %741 = dma.done.wait (%p868_p8), %s260_s18, 1024  }
  0x2f   : > { %743 = vsyncadd (%p868_p8), %s260_s18, 4294966272  ;;  %v775_v2 = vmov 0.0   ;;  %v776_v3 = vmov 0   ;;  %v915_v4 = vld [vmem:[%s263_s19 + $0x38] sm:$0xff]  ;;  %v917_v5 = vld [vmem:[%s263_s19 + $0x30] sm:$0xff]  ;;  %vm309_vm0 = vcmask 261120   ;;  %v428_v33 = vlaneseq }
  0x30   : > { %377 = vmatprep.mubr.f32.mxu0 %v775_v2  ;;  %652 = vset.pattern.permute.xlu0 %v776_v3  ;;  %v919_v6 = vld [vmem:[%s263_s19 + $0x28] sm:$0xff]  ;;  %v922_v7 = vld [vmem:[%s263_s19 + $0x20] sm:$0xff]  ;;  %v925_v8 = vld [vmem:[%s263_s19 + $0x18] sm:$0xff]  ;;  %s583_s5 = sshll.u32 %s762_s28, 10  ;;  %s291_s30 = scalar_lea.vmem [#allocation7], %s573_s17 }
  0x31   : > { %653 = vset.pattern.permute.xlu1 %v776_v3  ;;  %337 = vmatprep.subr.mxu0 %v915_v4  ;;  %v928_v9 = vld [vmem:[%s263_s19 + $0x10] sm:$0xff]  ;;  %v303_v10 = vld [vmem:[%s1014_s2] sm:$0xff]  ;;  %v937_v12 = vld [vmem:[%s263_s19 + $0x8] sm:$0xff]  ;;  %v429_v38 = vshrl.u32 %v428_v33, 7  ;;  %s478_s8 = sshll.u32 %s291_s30, 4  ;;  %s958_s15 = scalar_lea.hbm %s1017_s6, %s583_s5  ;;  %s960_s8 = int_to_ptr.vmem [resolvable:$true] %s478_s8 }
  0x32   : > { %338 = vmatpush1.msra.mxu0 %v917_v5  ;;  %v402_v11 = vld [vmem:[%s1016_s4] sm:$0xff]  ;;  %306 = vperm.xlu0 %652, %v303_v10   ;;  %s463_s28 = scalar_lea.sflag [#allocation6], %s905_s16  ;;  %s690_s17 = scalar_lea.vmem %s960_s8, 1024 }
  0x33   : > { %339 = vmatprep.subr.mxu0 %v919_v6  ;;  %v940_v13 = vld [vmem:[%s263_s19] sm:$0xff]  ;;  %v576_v14 = vld [vmem:[#allocation2] ss:$0 sm:$0xff]  ;;  %405 = vperm.xlu1 %653, %v402_v11   ;;  %v422_v16 = vld [vmem:[#allocation3] sm:$0x1]  ;;  %v430_v43 = vsub.s32 0, %v429_v38  ;;  %p691_p8 = scmp.ne.s32.totalorder %s960_s8, %s690_s17 }
  0x34   : > { %340 = vmatpush1.msra.mxu0 %v922_v7  ;;  %v302_v15 = vld [vmem:[%s1013_s1] sm:$0xff]  ;;  %s777_s18 = smov [#allocation7]  }
  0x35   : > { %341 = vmatprep.subr.mxu0 %v925_v8  ;;  %p692_p12 = pnand %p691_p8, %p872_p9  ;;  %s694_s19 = sshll.u32 %s777_s18, 4  ;;  %s695_s19 = int_to_ptr.vmem [resolvable:$false] %s694_s19 }
  0x36   : > { %342 = vmatpush1.msra.mxu0 %v928_v9  ;;  %395 = vperm.xlu0 %652, %v576_v14   ;;  %s696_s11 = scalar_lea.vmem %s695_s19, 2048  ;;  %p697_p1 = scmp.lt.s32.totalorder %s960_s8, %s695_s19 }
  0x37   : > { %343 = vmatprep.subr.mxu0 %v937_v12  ;;  %425 = vperm.xlu1 %653, %v422_v16   ;;  %p693_p0 = pneg %p692_p12  ;;  %p698_p3 = scmp.lt.s32.totalorder %s696_s11, %s690_s17 }
  0x38   : > { %344 = vmatpush1.msra.mxu0 %v940_v13 }
  0x39   : > { %575 = vmatmul.mubr.msk.f32.vlgmr.msra.gmra.mxu0 %vm309_vm0, %v302_v15  ;;  %p699_p5 = por %p698_p3, %p697_p1 }
  0x3b   : > { %p700_p6 = pnand %p699_p5, %p693_p0 }
  0xad   : > { %v307_v17 = vpop.permute.xlu0 %306 }
  0xae   : > { %v406_v30 = vpop.permute.xlu1 %405 }
  0xb1   : > { %v396_v23 = vpop.permute.xlu0 %395 }
  0xb2   : > { %v426_v44 = vpop.permute.xlu1 %425 }
  0xb3   : > { %v431_v49 = vrot.slane %v426_v44, %v430_v43 }
  0xf9   : > { %v379_v18 = vpop.f32.mrf.mxu0 }
  0xfa   : > { %v380_v19 = vadd.f32 %v379_v18, %v307_v17 }
  0xfb   : > { %v381_v20 = vpop.f32.mrf.mxu0 }
  0xfc   : > { %v387_v21 = vmin.f32 %v380_v19, 0.0  ;;  %v382_v22 = vadd.f32 %v381_v20, %v307_v17  ;;  %v385_v24 = vmax.f32 %v380_v19, 0.0 }
  0xfe   : > { %v398_v25 = vmul.f32 %v396_v23, %v387_v21  ;;  %v388_v26 = vmin.f32 %v382_v22, 0.0  ;;  %v386_v28 = vmax.f32 %v382_v22, 0.0 }
 0x100   : > { %v400_v27 = vadd.f32 %v398_v25, %v385_v24  ;;  %v399_v29 = vmul.f32 %v396_v23, %v388_v26 }
 0x102   : > { %v401_v31 = vadd.f32 %v399_v29, %v386_v28  ;;  %v408_v32 = vmul.f32 %v406_v30, %v400_v27 }
 0x104   : > { %v409_v34 = vmul.f32 %v406_v30, %v401_v31  ;;  %v410_v35 = vrot.slane %v408_v32, 4 }
 0x106   : > { %v411_v36 = vadd.f32 %v410_v35, %v408_v32  ;;  %v416_v37 = vrot.slane %v409_v34, 4 }
 0x108   : > { %v412_v39 = vrot.slane %v411_v36, 2  ;;  %v417_v40 = vadd.f32 %v416_v37, %v409_v34 }
 0x10a   : > { %v413_v41 = vadd.f32 %v412_v39, %v411_v36  ;;  %v418_v42 = vrot.slane %v417_v40, 2 }
 0x10c   : > { %v419_v45 = vadd.f32 %v418_v42, %v417_v40  ;;  %v414_v46 = vrot.slane %v413_v41, 1 }
 0x10e   : > { %v415_v47 = vadd.f32 %v414_v46, %v413_v41  ;;  %v420_v48 = vrot.slane %v419_v45, 1 }
 0x110   : > { %v421_v50 = vadd.f32 %v420_v48, %v419_v45  ;;  %v432_v51 = vadd.f32 %v431_v49, %v415_v47 }
 0x112   : > { %v433_v52 = vadd.f32 %v431_v49, %v421_v50  ;;  %v434_v53 = vsub.f32 0.0, %v432_v51 }
 0x114   : > { %v435_v54 = vsub.f32 0.0, %v433_v52  ;;  %v436_v55 = vmul.f32 1.442695, %v434_v53 }
 0x116   : > { %654 = vpow2.f32 %v436_v55  ;;  %v438_v56 = vmul.f32 1.442695, %v435_v54 }
 0x118   : > { %656 = vpow2.f32 %v438_v56 }
 0x123   : > { %v655_v57 = vpop.eup %654 }
 0x124   : > { %v440_v58 = vadd.f32 1.0, %v655_v57 }
 0x125   : > { %v657_v59 = vpop.eup %656 }
 0x126   : > { %v441_v60 = vadd.f32 1.0, %v657_v59  ;;  %658 = vrcp.f32 %v440_v58 }
 0x128   : > { %660 = vrcp.f32 %v441_v60 }
 0x133   : > { %v659_v61 = vpop.eup %658 }
 0x134   : > { %v446_v62 = vmul.f32 %v659_v61, %v940_v13  ;;  %v448_v63 = vmul.f32 %v659_v61, %v928_v9  ;;  %v450_v0 = vmul.f32 %v659_v61, %v922_v7  ;;  %v452_v1 = vmul.f32 %v659_v61, %v917_v5 }
 0x135   : > { %v661_v2 = vpop.eup %660 }
 0x136   : > { %v447_v3 = vmul.f32 %v661_v2, %v937_v12  ;;  %v449_v9 = vmul.f32 %v661_v2, %v925_v8  ;;  %v451_v7 = vmul.f32 %v661_v2, %v919_v6  ;;  %v453_v5 = vmul.f32 %v661_v2, %v915_v4  ;;  %454 = vst [vmem:[%s291_s30] sm:$0xff] %v446_v62 }
 0x137   : > { %456 = vst [vmem:[%s291_s30 + $0x10] sm:$0xff] %v448_v63  ;;  %458 = vst [vmem:[%s291_s30 + $0x20] sm:$0xff] %v450_v0 }
 0x138   : > { %460 = vst [vmem:[%s291_s30 + $0x30] sm:$0xff] %v452_v1  ;;  %455 = vst [vmem:[%s291_s30 + $0x8] sm:$0xff] %v447_v3 }
 0x139   : > { %457 = vst [vmem:[%s291_s30 + $0x18] sm:$0xff] %v449_v9  ;;  %459 = vst [vmem:[%s291_s30 + $0x28] sm:$0xff] %v451_v7 }
 0x13a   : > { %461 = vst [vmem:[%s291_s30 + $0x38] sm:$0xff] %v453_v5 }
 0x13b   : > { %703 = shalt.err (!%p700_p6)
}
 0x13c   : > { %s704_s20 = scalar_lea.hbm %s958_s15, 1024  ;;  %s708_s23 = scalar_lea.hbm %s1017_s6, 2048 }
 0x13d   : > { %p705_p7 = scmp.ne.s32.totalorder %s958_s15, %s704_s20  ;;  %p709_p13 = scmp.lt.s32.totalorder %s958_s15, %s1017_s6 }
 0x13e   : > { %p710_p2 = scmp.lt.s32.totalorder %s708_s23, %s704_s20 }
 0x13f   : > { %p706_p10 = pnand %p705_p7, %p872_p9 }
 0x140   : > { %p711_p8 = por %p710_p2, %p709_p13 }
 0x141   : > { %p707_p4 = pneg %p706_p10 }
 0x143   : > { %p712_p12 = pnand %p711_p8, %p707_p4 }
 0x145   : > { %715 = shalt.err (!%p712_p12)
}
 0x146   : > { %s778_s30 = smov 256   ;;  %s779_s10 = smov 16  }
 0x147   : > { %586 = dma.vmem_to_hbm [thread:$0]  (%p872_p9), %s960_s8, 1024, %s958_s15, %s463_s28, %s778_s30, %s778_s30, %s779_s10  }
 0x148 PF: > { %s493_s9 = sand.u32 1, %s750_s25   ;;  %p1024_p0 = scmp.ge.s32.totalorder %s770_s3, 2 }
 0x149   : > { %s494_s17 = scalar_lea.sflag [#allocation6], %s493_s9 }
 0x14a   : > { %p593_p1 = pnand %p1024_p0, %p879_p11 }
 0x14c   : > { %p594_p3 = pneg %p593_p1 }
 0x14e   : > { %745 = dma.done.wait (%p594_p3), %s494_s17, 1024  }
 0x14f   : > { %747 = vsyncadd (%p594_p3), %s494_s17, 4294966272  ;;  %s26_s3 = sadd.s32 1, %s770_s3   ;;  %s1025_s25 = smov %s754_s26 }
 0x150   : > { %p23_p5 = scmp.ge.s32.totalorder %s26_s3, 4   ;;  %s1026_s26 = smov %s758_s27 }
 0x151   : > { %s1027_s27 = smov %s877_s13  ;;  %s1028_s28 = smov %s766_s29 }
 0x152   : > { %s1029_s29 = smov %s1031_s7  ;;  %25 = sbr.rel (!%p23_p5) target bundleno = 9 (0x9), region = 89 }
 0x157   :  { %499 = vsyncpa [#allocation5], 1 }
 0x158   :  { %501 = vsyncpa [#allocation5 + $0x1], 1 }
 0x159   :  { %502 = vsyncpa [#allocation6], 1 }
 0x15a   :  { %504 = vsyncpa [#allocation6 + $0x1], 1 }

</bundles_post_ra>
